<compile_context>
chip_gen: v5e
topology: v5e:2x2
jax: 0.10.0
libtpu: 0.0.40
codegen_flags: <defaults>
</compile_context>

<pallas_src>
import functools

import jax
import jax.numpy as jnp
from jax.experimental import pallas as pl
from jax.experimental.pallas import tpu as pltpu


def _round_up(x, m):
    return ((x + m - 1) // m) * m


def _mlp_kernel(x_ref, w1_ref, b1_ref, w2_ref, b2_ref, w3_ref, b3_ref, o_ref):
    # x arrives f32; cast to bf16 in-kernel (VPU, hidden under MXU work). f32 accumulation throughout.
    x = x_ref[...].astype(jnp.bfloat16)                                     # (bm, Din)

    h = jnp.dot(x, w1_ref[...], preferred_element_type=jnp.float32) + b1_ref[...]
    h = jnp.maximum(h, 0.0)                                                 # ReLU
    # dropout(p=0) -> identity

    h = jnp.dot(h.astype(jnp.bfloat16), w2_ref[...],
                preferred_element_type=jnp.float32) + b2_ref[...]
    h = jnp.maximum(h, 0.0)                                                 # ReLU
    # dropout(p=0) -> identity

    o = jnp.dot(h.astype(jnp.bfloat16), w3_ref[...],
                preferred_element_type=jnp.float32) + b3_ref[...]           # (bm, o_pad) f32
    # Store only the true output columns: avoids a separate HBM slice pass after the kernel.
    # NOTE: rows of a partial last batch tile are computed on padding and masked on writeback;
    # this is safe only because there is no cross-row coupling in this kernel.
    o_ref[...] = o[:, : o_ref.shape[-1]].astype(o_ref.dtype)


def prepare_mlp_params(params, mxu_pad=128):
    """One-time prep (call OUTSIDE jit / once per model): transpose PyTorch (out,in) weights to
    (in,out), cast weights to bf16, zero-pad hidden/output dims to multiples of `mxu_pad`
    (128 default; use 256 on v6e/v7x for large hidden sizes to fill the 2x256^2 MXU).
    Zero padding is exact: padded hidden units stay 0 through bias+ReLU and contribute nothing.
    Biases stay f32 (added post-MXU)."""
    input_dim = params["w1"].shape[1]
    hidden_dim = params["w1"].shape[0]
    output_dim = params["w3"].shape[0]
    h_pad = _round_up(max(hidden_dim, mxu_pad), mxu_pad)
    o_pad = _round_up(max(output_dim, mxu_pad), mxu_pad)
    # TODO(synk): if input_dim is not a multiple of 128, pad Din here too (and pad x once upstream)
    # to make the first matmul's K dim lane-dense.

    def pad2(a, rows, cols):
        return jnp.pad(a, ((0, rows - a.shape[0]), (0, cols - a.shape[1])))

    w1 = pad2(params["w1"].T, input_dim, h_pad).astype(jnp.bfloat16)        # (Din, Hp)
    w2 = pad2(params["w2"].T, h_pad, h_pad).astype(jnp.bfloat16)            # (Hp, Hp)
    w3 = pad2(params["w3"].T, h_pad, o_pad).astype(jnp.bfloat16)            # (Hp, Op)
    b1 = jnp.pad(params["b1"], (0, h_pad - hidden_dim)).reshape(1, h_pad).astype(jnp.float32)
    b2 = jnp.pad(params["b2"], (0, h_pad - hidden_dim)).reshape(1, h_pad).astype(jnp.float32)
    b3 = jnp.pad(params["b3"], (0, o_pad - output_dim)).reshape(1, o_pad).astype(jnp.float32)
    return {"w1": w1, "b1": b1, "w2": w2, "b2": b2, "w3": w3, "b3": b3}


@functools.partial(jax.jit, static_argnames=("output_dim", "block_m"))
def mlp_forward(x, prep, output_dim, block_m=256):
    """x: (B, input_dim) float32. prep: output of prepare_mlp_params. Returns (B, output_dim) f32."""
    B, input_dim = x.shape
    h_pad = prep["w1"].shape[1]
    o_pad = prep["w3"].shape[1]

    # Batch tile: multiple of 16 rows (bf16 sublane packing), <= block_m, and sized so the grid has
    # >= 2 "parallel" steps whenever possible (v7x has 2 TensorCores sharding the parallel axis).
    bm = max(16, min(block_m, _round_up(pl.cdiv(B, 2), 16)))
    grid = (pl.cdiv(B, bm),)

    # VMEM budget: resident weights/biases single-buffered, x/out tiles double-buffered,
    # plus rough room for the f32/bf16 intermediates. 2x headroom, capped below v7x physical.
    weight_bytes = (input_dim * h_pad + h_pad * h_pad + h_pad * o_pad) * 2      # bf16, Buffered(1)
    bias_bytes = (2 * h_pad + o_pad) * 4
    x_tile_bytes = bm * input_dim * 4 * 2                                       # f32, double-buffered
    out_tile_bytes = bm * output_dim * 4 * 2                                    # f32, double-buffered
    interm_bytes = 3 * bm * h_pad * 4                                           # h (f32 + bf16) slack
    vmem_needed = weight_bytes + bias_bytes + x_tile_bytes + out_tile_bytes + interm_bytes
    vmem_limit = int(min(max(2 * vmem_needed, 16 * 1024 * 1024), 48 * 1024 * 1024))

    flops = 2 * B * (input_dim * h_pad + h_pad * h_pad + h_pad * o_pad)
    bytes_accessed = (
        B * input_dim * 4                                           # x (f32, DMA'd once)
        + weight_bytes + bias_bytes                                 # weights (bf16) + biases (f32)
        + B * output_dim * 4                                        # out (f32, unpadded)
    )

    out = pl.pallas_call(
        _mlp_kernel,
        out_shape=jax.ShapeDtypeStruct((B, output_dim), jnp.float32),
        grid=grid,
        in_specs=[
            # batch-tiled activations (f32; cast to bf16 inside the kernel)
            pl.BlockSpec((bm, input_dim), lambda i: (i, 0)),
            # weights / biases: constant index -> resident across the grid; single-buffered.
            pl.BlockSpec((input_dim, h_pad), lambda i: (0, 0), pipeline_mode=pl.Buffered(1)),
            pl.BlockSpec((1, h_pad), lambda i: (0, 0), pipeline_mode=pl.Buffered(1)),
            pl.BlockSpec((h_pad, h_pad), lambda i: (0, 0), pipeline_mode=pl.Buffered(1)),
            pl.BlockSpec((1, h_pad), lambda i: (0, 0), pipeline_mode=pl.Buffered(1)),
            pl.BlockSpec((h_pad, o_pad), lambda i: (0, 0), pipeline_mode=pl.Buffered(1)),
            pl.BlockSpec((1, o_pad), lambda i: (0, 0), pipeline_mode=pl.Buffered(1)),
        ],
        # True output width (== full array last dim), written straight from the kernel.
        out_specs=pl.BlockSpec((bm, output_dim), lambda i: (i, 0)),
        compiler_params=pltpu.CompilerParams(
            dimension_semantics=("parallel",),
            vmem_limit_bytes=vmem_limit,
        ),
        cost_estimate=pl.CostEstimate(
            flops=flops, transcendentals=0, bytes_accessed=bytes_accessed),
    )(x, prep["w1"], prep["b1"], prep["w2"], prep["b2"], prep["w3"], prep["b3"])

    return out


def init_mlp_params(key, input_dim, output_dim, hidden_dim=0):
    """Deterministic init mirroring nn.Linear default: U(-1/sqrt(fan_in), 1/sqrt(fan_in)).
    Weights kept in PyTorch (out_features, in_features) layout."""
    if hidden_dim == 0:
        hidden_dim = input_dim // 4
    ks = jax.random.split(key, 6)

    def lin(kw, kb, fan_in, fan_out):
        bound = 1.0 / jnp.sqrt(fan_in)
        w = jax.random.uniform(kw, (fan_out, fan_in), jnp.float32, -bound, bound)
        b = jax.random.uniform(kb, (fan_out,), jnp.float32, -bound, bound)
        return w, b

    w1, b1 = lin(ks[0], ks[1], input_dim, hidden_dim)
    w2, b2 = lin(ks[2], ks[3], hidden_dim, hidden_dim)
    w3, b3 = lin(ks[4], ks[5], hidden_dim, output_dim)
    return {"w1": w1, "b1": b1, "w2": w2, "b2": b2, "w3": w3, "b3": b3}


def mlp_reference(x, p):
    # Pure-f32 reference in the original PyTorch layout.
    h = jnp.maximum(x @ p["w1"].T + p["b1"], 0.0)
    h = jnp.maximum(h @ p["w2"].T + p["b2"], 0.0)
    return h @ p["w3"].T + p["b3"]


if __name__ == "__main__":
    key = jax.random.PRNGKey(0)
    k_x, k_p = jax.random.split(key)

    # Small demo shapes; bm sizing still yields a 2-step parallel grid (v7x megacore friendly).
    batch, input_dim, output_dim = 128, 128, 64   # hidden_dim = input_dim // 4 = 32 (padded to 128)
    x = jax.random.normal(k_x, (batch, input_dim), dtype=jnp.float32)
    params = init_mlp_params(k_p, input_dim, output_dim)

    prep = prepare_mlp_params(params)             # one-time layout/dtype/padding prep (outside jit)

    out = mlp_forward(x, prep, output_dim, block_m=256)
    out = jax.block_until_ready(out)

    ref = mlp_reference(x, params)
    assert out.shape == (batch, output_dim)
    # bf16 MXU operands with f32 accumulation -> looser tolerance than pure f32.
    max_err = float(jnp.max(jnp.abs(out - ref)))
    assert jnp.allclose(out, ref, atol=5e-2, rtol=5e-2), f"mismatch vs reference (max abs err {max_err})"
    print("KERNEL_OK")
</pallas_src>

<mosaic_0001>
module attributes {stable_mosaic.version = 11 : i64} {
  func.func @_mlp_kernel(%arg0: i32, %arg1: memref<64x128xf32, #tpu.memory_space<vmem>>, %arg2: memref<128x128xbf16, #tpu.memory_space<vmem>>, %arg3: memref<1x128xf32, #tpu.memory_space<vmem>>, %arg4: memref<128x128xbf16, #tpu.memory_space<vmem>>, %arg5: memref<1x128xf32, #tpu.memory_space<vmem>>, %arg6: memref<128x128xbf16, #tpu.memory_space<vmem>>, %arg7: memref<1x128xf32, #tpu.memory_space<vmem>>, %arg8: memref<64x64xf32, #tpu.memory_space<vmem>>) attributes {dimension_semantics = [#tpu.dimension_semantics<parallel>], iteration_bounds = array<i64: 2>, scalar_prefetch = 0 : i64, scratch_operands = 0 : i64, tpu.core_type = #tpu.core_type<tc>, window_params = [{transform_indices = @transform_0, window_bounds = array<i64: 64, 128>}, {pipeline_mode = #tpu.pipeline_mode<synchronous>, transform_indices = @transform_1, window_bounds = array<i64: 128, 128>}, {pipeline_mode = #tpu.pipeline_mode<synchronous>, transform_indices = @transform_2, window_bounds = array<i64: 1, 128>}, {pipeline_mode = #tpu.pipeline_mode<synchronous>, transform_indices = @transform_3, window_bounds = array<i64: 128, 128>}, {pipeline_mode = #tpu.pipeline_mode<synchronous>, transform_indices = @transform_4, window_bounds = array<i64: 1, 128>}, {pipeline_mode = #tpu.pipeline_mode<synchronous>, transform_indices = @transform_5, window_bounds = array<i64: 128, 128>}, {pipeline_mode = #tpu.pipeline_mode<synchronous>, transform_indices = @transform_6, window_bounds = array<i64: 1, 128>}, {transform_indices = @transform_7, window_bounds = array<i64: 64, 64>}]} {
    %c0 = arith.constant 0 : index
    %c0_0 = arith.constant 0 : index
    %0 = vector.load %arg1[%c0, %c0_0] : memref<64x128xf32, #tpu.memory_space<vmem>>, vector<64x128xf32>
    %1 = arith.truncf %0 : vector<64x128xf32> to vector<64x128xbf16>
    %c0_1 = arith.constant 0 : index
    %c0_2 = arith.constant 0 : index
    %2 = vector.load %arg2[%c0_1, %c0_2] : memref<128x128xbf16, #tpu.memory_space<vmem>>, vector<128x128xbf16>
    %cst = arith.constant dense<0.000000e+00> : vector<64x128xf32>
    %3 = tpu.matmul %1, %2, %cst {dimension_numbers = #tpu.dot_dimension_numbers<[1], [0], [0], [1], [0, 0, 1, 1], [], []>} : vector<64x128xbf16>, vector<128x128xbf16>, vector<64x128xf32> -> vector<64x128xf32>
    %c0_3 = arith.constant 0 : index
    %c0_4 = arith.constant 0 : index
    %4 = vector.load %arg3[%c0_3, %c0_4] : memref<1x128xf32, #tpu.memory_space<vmem>>, vector<1x128xf32>
    %5 = vector.broadcast %4 : vector<1x128xf32> to vector<64x128xf32>
    %6 = arith.addf %3, %5 : vector<64x128xf32>
    %cst_5 = arith.constant 0.000000e+00 : f32
    %7 = vector.broadcast %cst_5 : f32 to vector<64x128xf32>
    %8 = arith.maximumf %6, %7 : vector<64x128xf32>
    %9 = arith.truncf %8 : vector<64x128xf32> to vector<64x128xbf16>
    %c0_6 = arith.constant 0 : index
    %c0_7 = arith.constant 0 : index
    %10 = vector.load %arg4[%c0_6, %c0_7] : memref<128x128xbf16, #tpu.memory_space<vmem>>, vector<128x128xbf16>
    %cst_8 = arith.constant dense<0.000000e+00> : vector<64x128xf32>
    %11 = tpu.matmul %9, %10, %cst_8 {dimension_numbers = #tpu.dot_dimension_numbers<[1], [0], [0], [1], [0, 0, 1, 1], [], []>} : vector<64x128xbf16>, vector<128x128xbf16>, vector<64x128xf32> -> vector<64x128xf32>
    %c0_9 = arith.constant 0 : index
    %c0_10 = arith.constant 0 : index
    %12 = vector.load %arg5[%c0_9, %c0_10] : memref<1x128xf32, #tpu.memory_space<vmem>>, vector<1x128xf32>
    %13 = vector.broadcast %12 : vector<1x128xf32> to vector<64x128xf32>
    %14 = arith.addf %11, %13 : vector<64x128xf32>
    %cst_11 = arith.constant 0.000000e+00 : f32
    %15 = vector.broadcast %cst_11 : f32 to vector<64x128xf32>
    %16 = arith.maximumf %14, %15 : vector<64x128xf32>
    %17 = arith.truncf %16 : vector<64x128xf32> to vector<64x128xbf16>
    %c0_12 = arith.constant 0 : index
    %c0_13 = arith.constant 0 : index
    %18 = vector.load %arg6[%c0_12, %c0_13] : memref<128x128xbf16, #tpu.memory_space<vmem>>, vector<128x128xbf16>
    %cst_14 = arith.constant dense<0.000000e+00> : vector<64x128xf32>
    %19 = tpu.matmul %17, %18, %cst_14 {dimension_numbers = #tpu.dot_dimension_numbers<[1], [0], [0], [1], [0, 0, 1, 1], [], []>} : vector<64x128xbf16>, vector<128x128xbf16>, vector<64x128xf32> -> vector<64x128xf32>
    %c0_15 = arith.constant 0 : index
    %c0_16 = arith.constant 0 : index
    %20 = vector.load %arg7[%c0_15, %c0_16] : memref<1x128xf32, #tpu.memory_space<vmem>>, vector<1x128xf32>
    %21 = vector.broadcast %20 : vector<1x128xf32> to vector<64x128xf32>
    %22 = arith.addf %19, %21 : vector<64x128xf32>
    %23 = vector.extract_strided_slice %22 {offsets = [0, 0], sizes = [64, 64], strides = [1, 1]} : vector<64x128xf32> to vector<64x64xf32>
    %c0_17 = arith.constant 0 : index
    %c0_18 = arith.constant 0 : index
    %24 = vector.load %arg8[%c0_17, %c0_18] : memref<64x64xf32, #tpu.memory_space<vmem>>, vector<64x64xf32>
    tpu.vector_store %arg8[%c0_17, %c0_18], %23 {strides = array<i32>} : memref<64x64xf32, #tpu.memory_space<vmem>>, vector<64x64xf32>,
    return
  }
  func.func @transform_0(%arg0: i32) -> (i32, i32) {
    %c0_i32 = arith.constant 0 : i32
    %c0_i32_0 = arith.constant 0 : i32
    return %arg0, %c0_i32 : i32, i32
  }
  func.func @transform_1(%arg0: i32) -> (i32, i32) {
    %c0_i32 = arith.constant 0 : i32
    %c0_i32_0 = arith.constant 0 : i32
    %c0_i32_1 = arith.constant 0 : i32
    return %c0_i32, %c0_i32_0 : i32, i32
  }
  func.func @transform_2(%arg0: i32) -> (i32, i32) {
    %c0_i32 = arith.constant 0 : i32
    %c0_i32_0 = arith.constant 0 : i32
    %c0_i32_1 = arith.constant 0 : i32
    return %c0_i32, %c0_i32_0 : i32, i32
  }
  func.func @transform_3(%arg0: i32) -> (i32, i32) {
    %c0_i32 = arith.constant 0 : i32
    %c0_i32_0 = arith.constant 0 : i32
    %c0_i32_1 = arith.constant 0 : i32
    return %c0_i32, %c0_i32_0 : i32, i32
  }
  func.func @transform_4(%arg0: i32) -> (i32, i32) {
    %c0_i32 = arith.constant 0 : i32
    %c0_i32_0 = arith.constant 0 : i32
    %c0_i32_1 = arith.constant 0 : i32
    return %c0_i32, %c0_i32_0 : i32, i32
  }
  func.func @transform_5(%arg0: i32) -> (i32, i32) {
    %c0_i32 = arith.constant 0 : i32
    %c0_i32_0 = arith.constant 0 : i32
    %c0_i32_1 = arith.constant 0 : i32
    return %c0_i32, %c0_i32_0 : i32, i32
  }
  func.func @transform_6(%arg0: i32) -> (i32, i32) {
    %c0_i32 = arith.constant 0 : i32
    %c0_i32_0 = arith.constant 0 : i32
    %c0_i32_1 = arith.constant 0 : i32
    return %c0_i32, %c0_i32_0 : i32, i32
  }
  func.func @transform_7(%arg0: i32) -> (i32, i32) {
    %c0_i32 = arith.constant 0 : i32
    %c0_i32_0 = arith.constant 0 : i32
    return %arg0, %c0_i32 : i32, i32
  }
}

</mosaic_0001>

<bundles_post_ra>
// kernel: mlp_forward.1
= control target key start
LH: loop header
LB: loop body
LE: loop exit
PB: predicated region body
PF: predicated region fallthrough
CT: control target
= control target key end

     0   :  { %12 = vsyncpa [#allocation3], 0  ;;  %s1442_s0 = inlined_call_operand.hbm [shape: f32[128,128], index: 0, kind: input, shape index: {}]   ;;  %s1443_s1 = inlined_call_operand.hbm [shape: bf16[128,128], index: 1, kind: input, shape index: {}]   ;;  %s1444_s2 = inlined_call_operand.hbm [shape: f32[1,128], index: 2, kind: input, shape index: {}]   ;;  %s1445_s3 = inlined_call_operand.hbm [shape: bf16[128,128], index: 3, kind: input, shape index: {}]   ;;  %s1446_s4 = inlined_call_operand.vmem [shape: f32[1,128], index: 4, kind: input, shape index: {}]   ;;  %s1447_s5 = inlined_call_operand.hbm [shape: bf16[128,128], index: 5, kind: input, shape index: {}]   ;;  %s1448_s6 = inlined_call_operand.vmem [shape: f32[1,128], index: 6, kind: input, shape index: {}]   ;;  %s1449_s7 = inlined_call_operand.vmem [shape: f32[128,64], index: 7, kind: output, shape index: {}]  }
   0x1   :  { %14 = vsyncpa [#allocation3 + $0x1], 0 }
   0x2   :  { %15 = vsyncpa [#allocation5], 0 }
   0x3   :  { %16 = vsyncpa [#allocation8], 0  ;;  %s1287_s24 = smov 0   ;;  %s1289_s25 = smov 0  }
   0x4   :  { %s1291_s26 = smov 0   ;;  %s1293_s27 = smov 0  }
   0x5 LB: > { %s1450_s28 = sadd.s32 4294967295, %s1237_s27   ;;  %p42_p0 = scmp.ne.s32.totalorder %s1229_s25, %s1225_s24  ;;  %s1237_s27 = sphi %s1293_s27, %s1460_s27   ;;  %s1233_s26 = sphi %s1291_s26, %s1459_s26   ;;  %s1229_s25 = sphi %s1289_s25, %s1458_s25   ;;  %s1225_s24 = sphi %s1287_s24, %s1457_s24  }
   0x6   : > { %p1309_p1 = scmp.eq.s32.totalorder %s1450_s28, 0  ;;  %p810_p2 = scmp.ge.s32.totalorder %s1237_s27, 1 }
   0x7   : > { %p205_p3 = scmp.lt.s32.totalorder %s1237_s27, 3  ;;  %s216_s10 = sshll.u32 %s1443_s1, 4  ;;  %s217_s10 = int_to_ptr.hbm [resolvable:$true] %s216_s10 }
   0x8   : > { %p1317_p4 = por %p1309_p1, %p42_p0  ;;  %s1239_s12 = smov [#allocation4]  }
   0x9   : > { %p1324_p5 = pnand %p810_p2, %p205_p3  ;;  %s218_s13 = sshll.u32 %s1239_s12, 4  ;;  %s219_s13 = int_to_ptr.vmem [resolvable:$true] %s218_s13 }
   0xa   : > { %s242_s17 = sshll.u32 %s1445_s3, 4  ;;  %s1240_s18 = smov 64   ;;  %s243_s17 = int_to_ptr.hbm [resolvable:$true] %s242_s17 }
   0xb   : > { %p976_p6 = pneg %p1324_p5  ;;  %s1241_s19 = smov 4  }
   0xc   : > { %s1242_s20 = smov [#allocation7]   ;;  %s231_s24 = sshll.u32 %s1444_s2, 4  ;;  %s232_s24 = int_to_ptr.hbm [resolvable:$true] %s231_s24 }
   0xd   : > { %p1332_p7 = pnand %p976_p6, %p1309_p1  ;;  %s244_s21 = sshll.u32 %s1242_s20, 4  ;;  %s245_s21 = int_to_ptr.vmem [resolvable:$true] %s244_s21 }
   0xe   : > { %s1243_s12 = smov [#allocation6]   ;;  %s1244_s15 = smov [#allocation9]  }
   0xf   : > { %979 = dma.hbm_to_vmem [thread:$0]  (!%p1332_p7), %s217_s10, 1024, %s219_s13, [#allocation5], %s1240_s18, %s1240_s18, %s1241_s19  }
  0x10   : > { %985 = dma.hbm_to_vmem [thread:$0]  (!%p1332_p7), %s243_s17, 1024, %s245_s21, [#allocation8], %s1240_s18, %s1240_s18, %s1241_s19  }
  0x11   : > { %s259_s10 = sshll.u32 %s1447_s5, 4  ;;  %s233_s13 = sshll.u32 %s1243_s12, 4  ;;  %s260_s10 = int_to_ptr.hbm [resolvable:$true] %s259_s10  ;;  %s234_s13 = int_to_ptr.vmem [resolvable:$true] %s233_s13 }
  0x12   : > { %982 = dma.hbm_to_vmem [thread:$0]  (!%p1332_p7), %s232_s24, 16, %s234_s13, [#allocation5]  }
  0x13   : > { %s261_s16 = sshll.u32 %s1244_s15, 4  ;;  %s1354_s17 = sadd.s32 1, %s1237_s27   ;;  %s262_s16 = int_to_ptr.vmem [resolvable:$true] %s261_s16 }
  0x14   : > { %988 = dma.hbm_to_vmem [thread:$0]  (!%p1332_p7), %s260_s10, 1024, %s262_s16, [#allocation8], %s1240_s18, %s1240_s18, %s1241_s19  }
  0x15   : > { %s29_s20 = sadd.s32 1, %s1233_s26  ;;  %s26_s21 = ssub.s32 %s1237_s27, %s1354_s17 }
  0x16   : > { %p36_p8 = scmp.ne.s32.totalorder %s1233_s26, %s1229_s25  ;;  %p27_p9 = scmp.eq.s32.totalorder %s26_s21, 0 }
  0x17   : > { %p37_p10 = scmp.eq.s32.totalorder %s1237_s27, 0  ;;  %p997_p11 = scmp.lt.s32.totalorder %s1237_s27, 2 }
  0x18   : > { %s278_s22 = sand.u32 1, %s1233_s26   ;;  %s925_s8 = sshll.u32 %s1237_s27, 6 }
  0x19   : > { %s1365_s23 = scalar_select %p27_p9, %s1233_s26, %s29_s20  }
  0x1a   : > { %p38_p12 = por %p37_p10, %p36_p8  ;;  %s816_s24 = sshll.u32 %s278_s22, 6 }
  0x1b   : > { %s287_s14 = scalar_lea.hbm %s1442_s0, %s925_s8  ;;  %s282_s19 = scalar_lea.vmem [#allocation2], %s816_s24 }
  0x1c   : > { %s288_s18 = sshll.u32 %s287_s14, 4  ;;  %s290_s10 = sshll.u32 %s282_s19, 4  ;;  %s289_s18 = int_to_ptr.hbm [resolvable:$true] %s288_s18  ;;  %s291_s10 = int_to_ptr.vmem [resolvable:$true] %s290_s10 }
  0x1d   : > { %p1371_p13 = pnand %p997_p11, %p38_p12  ;;  %s279_s15 = scalar_lea.sflag [#allocation3], %s278_s22 }
  0x1e   : > { %s1165_s16 = sshra.s32 %s289_s18, 4  ;;  %s1172_s24 = scalar_lea.hbm %s1442_s0, 128  ;;  %s1166_s16 = int_to_ptr.hbm [resolvable:$true] %s1165_s16 }
  0x1f   : > { %s1167_s20 = scalar_lea.hbm %s1166_s16, 64  ;;  %p1169_p2 = pneg %p1371_p13 }
  0x20   : > { %p1168_p0 = scmp.ne.s32.totalorder %s1166_s16, %s1167_s20  ;;  %p1173_p7 = scmp.lt.s32.totalorder %s1166_s16, %s1442_s0 }
  0x21   : > { %p1174_p8 = scmp.lt.s32.totalorder %s1172_s24, %s1167_s20 }
  0x22   : > { %p1170_p3 = pnand %p1169_p2, %p1168_p0 }
  0x23   : > { %p1175_p9 = por %p1174_p8, %p1173_p7 }
  0x24   : > { %p1171_p6 = pneg %p1170_p3 }
  0x26   : > { %p1176_p10 = pnand %p1175_p9, %p1171_p6 }
  0x28   : > { %1179 = shalt.err (!%p1176_p10)
}
  0x29   : > { %s1245_s22 = smov 128   ;;  %s1246_s14 = smov 8  }
  0x2a   : > { %992 = dma.hbm_to_vmem [thread:$0]  (!%p1371_p13), %s289_s18, 1024, %s291_s10, %s279_s15, %s1245_s22, %s1245_s22, %s1246_s14  }
  0x2b   : > { %302 = sbr.rel (%p1324_p5) target bundleno = 556 (0x22c), region = 48  ;;  %s304_s19 = sand.u32 (!%p1324_p5), 1, %s1229_s25  }
  0x2c   : > { %s820_s21 = sshll.u32 (!%p1324_p5), %s304_s19, 6  ;;  %s305_s8 = scalar_lea.sflag (!%p1324_p5), [#allocation3], %s304_s19 }
  0x2d   : > { %s1388_s28 = scalar_lea.vmem (!%p1324_p5), [#allocation2], %s820_s21 }
  0x30   : > { %1212 = dma.done.wait (%p1317_p4), %s305_s8, 1024  }
  0x31   : > { %1214 = vsyncadd (%p1317_p4), %s305_s8, 4294966272 }
  0x32   : > { %1216 = dma.done.wait (%p1309_p1), [#allocation5], 1040  }
  0x33   : > { %1218 = vsyncadd (%p1309_p1), [#allocation5], 4294966256 }
  0x34   : > { %1220 = dma.done.wait (%p1309_p1), [#allocation8], 2048  }
  0x35   : > { %1222 = vsyncadd (%p1309_p1), [#allocation8], 4294965248  ;;  %v933_v0 = vld [vmem:[#allocation4 + $0x38] sm:$0xff]  ;;  %v932_v1 = vld [vmem:[#allocation4 + $0x30] sm:$0xff]  ;;  %s1456_s30 = sadd.s32 4294967295, %s1237_s27   ;;  %vm694_vm0 = vcmask 523264  }
  0x36   : > { %447 = vmatpush.bf16.msra.mxu0 %v933_v0  ;;  %950 = vmatpush.bf16.msra.mxu3 %v933_v0  ;;  %v931_v2 = vld [vmem:[#allocation4 + $0x28] sm:$0xff]  ;;  %v930_v3 = vld [vmem:[#allocation4 + $0x20] sm:$0xff]  ;;  %v929_v4 = vld [vmem:[#allocation4 + $0x18] sm:$0xff]  ;;  %s825_s11 = sshll.u32 %s1456_s30, 3 }
  0x37   : > { %v928_v5 = vld [vmem:[#allocation4 + $0x10] sm:$0xff]  ;;  %v927_v6 = vld [vmem:[#allocation4 + $0x8] sm:$0xff]  ;;  %v926_v7 = vld [vmem:[#allocation4] sm:$0xff]  ;;  %p362_p1 = scmp.lt.s32.totalorder %s825_s11, 15 }
  0x38   : > { %v367_v8 = vld [vmem:[%s1388_s28] sm:$0xff]  ;;  %v368_v9 = vld [vmem:[%s1388_s28 + $0x8] sm:$0xff]  ;;  %v369_v10 = vld [vmem:[%s1388_s28 + $0x10] sm:$0xff] }
  0x39   : > { %v370_v11 = vld [vmem:[%s1388_s28 + $0x18] sm:$0xff]  ;;  %v375_v12 = vpack.c.bf16 %v368_v9, %v367_v8  ;;  %v939_v16 = vld [vmem:[#allocation7 + $0x28] sm:$0xff]  ;;  %v371_v17 = vld [vmem:[%s1388_s28 + $0x20] sm:$0xff]  ;;  %s1462_s11 = smov (!%p362_p1, %s825_s11), 15 }
  0x3a   : > { %448 = vmatpush.bf16.msra.mxu0 %v932_v1  ;;  %951 = vmatpush.bf16.msra.mxu3 %v932_v1  ;;  %v376_v13 = vpack.c.bf16 %v370_v11, %v369_v10  ;;  %v941_v14 = vld [vmem:[#allocation7 + $0x38] sm:$0xff]  ;;  %v940_v15 = vld [vmem:[#allocation7 + $0x30] sm:$0xff]  ;;  %v372_v18 = vld [vmem:[%s1388_s28 + $0x28] sm:$0xff]  ;;  %s826_s18 = sshll.u32 %s1462_s11, 3 }
  0x3b   : > { %556 = vmatpush.bf16.msra.mxu1 %v941_v14  ;;  %v938_v19 = vld [vmem:[#allocation7 + $0x20] sm:$0xff]  ;;  %v377_v20 = vpack.c.bf16 %v372_v18, %v371_v17  ;;  %v373_v21 = vld [vmem:[%s1388_s28 + $0x30] sm:$0xff]  ;;  %v374_v22 = vld [vmem:[%s1388_s28 + $0x38] sm:$0xff]  ;;  %s365_s20 = scalar_lea.vmem %s1449_s7, %s826_s18 }
  0x3c   : > { %v378_v23 = vpack.c.bf16 %v374_v22, %v373_v21  ;;  %v937_v24 = vld [vmem:[#allocation7 + $0x18] sm:$0xff]  ;;  %v936_v25 = vld [vmem:[#allocation7 + $0x10] sm:$0xff]  ;;  %v935_v26 = vld [vmem:[#allocation7 + $0x8] sm:$0xff] }
  0x3d   : > { %v934_v27 = vld [vmem:[#allocation7] sm:$0xff]  ;;  %v1042_v29 = vld [vmem:[#allocation6] ss:$0 sm:$0xff]  ;;  %v948_v46 = vld [vmem:[#allocation9 + $0x30] sm:$0xff] }
  0x3e   : > { %449 = vmatpush.bf16.msra.mxu0 %v931_v2  ;;  %952 = vmatpush.bf16.msra.mxu3 %v931_v2  ;;  %v949_v45 = vld [vmem:[#allocation9 + $0x38] sm:$0xff]  ;;  %v947_v49 = vld [vmem:[#allocation9 + $0x28] sm:$0xff]  ;;  %v946_v53 = vld [vmem:[#allocation9 + $0x20] sm:$0xff] }
  0x3f   : > { %557 = vmatpush.bf16.msra.mxu1 %v940_v15  ;;  %665 = vmatpush.bf16.msra.mxu2 %v949_v45  ;;  %v945_v61 = vld [vmem:[#allocation9 + $0x18] sm:$0xff]  ;;  %v944_v62 = vld [vmem:[#allocation9 + $0x10] sm:$0xff]  ;;  %v943_v63 = vld [vmem:[#allocation9 + $0x8] sm:$0xff] }
  0x40   : > { %v942_v0 = vld [vmem:[#allocation9] sm:$0xff]  ;;  %v1043_v2 = vld [vmem:[%s1446_s4] ss:$0 sm:$0xff] }
  0x42   : > { %450 = vmatpush.bf16.msra.mxu0 %v930_v3  ;;  %953 = vmatpush.bf16.msra.mxu3 %v930_v3 }
  0x43   : > { %558 = vmatpush.bf16.msra.mxu1 %v939_v16  ;;  %666 = vmatpush.bf16.msra.mxu2 %v948_v46 }
  0x46   : > { %451 = vmatpush.bf16.msra.mxu0 %v929_v4  ;;  %954 = vmatpush.bf16.msra.mxu3 %v929_v4 }
  0x47   : > { %559 = vmatpush.bf16.msra.mxu1 %v938_v19  ;;  %667 = vmatpush.bf16.msra.mxu2 %v947_v49 }
  0x4a   : > { %452 = vmatpush.bf16.msra.mxu0 %v928_v5  ;;  %955 = vmatpush.bf16.msra.mxu3 %v928_v5 }
  0x4b   : > { %560 = vmatpush.bf16.msra.mxu1 %v937_v24  ;;  %668 = vmatpush.bf16.msra.mxu2 %v946_v53 }
  0x4e   : > { %453 = vmatpush.bf16.msra.mxu0 %v927_v6  ;;  %956 = vmatpush.bf16.msra.mxu3 %v927_v6 }
  0x4f   : > { %561 = vmatpush.bf16.msra.mxu1 %v936_v25  ;;  %669 = vmatpush.bf16.msra.mxu2 %v945_v61 }
  0x52   : > { %454 = vmatpush.bf16.msra.mxu0 %v926_v7  ;;  %957 = vmatpush.bf16.msra.mxu3 %v926_v7 }
  0x53   : > { %562 = vmatpush.bf16.msra.mxu1 %v935_v26  ;;  %670 = vmatpush.bf16.msra.mxu2 %v944_v62 }
  0x55   : > { %455 = vmatmul.bf16.vlgmr.msra.gmra.mxu0 %v375_v12  ;;  %460 = vmatmul.bf16.vlgmr.msra.gmra.mxu3 %v376_v13 }
  0x57   : > { %563 = vmatpush.bf16.msra.mxu1 %v934_v27  ;;  %671 = vmatpush.bf16.msra.mxu2 %v943_v63 }
  0x5b   : > { %672 = vmatpush.bf16.msra.mxu2 %v942_v0 }
  0x65   : > { %465 = vmatmul.bf16.gmra.mxu3 %v377_v20 }
  0x75   : > { %470 = vmatmul.bf16.gmra.mxu3 %v378_v23 }
  0xd2   : > { %v456_v28 = vpop.f32.mrf.mxu0 }
  0xd3   : > { %v457_v31 = vadd.f32 %v1042_v29, %v456_v28 }
  0xd5   : > { %v476_v34 = vmax.f32 %v457_v31, 0.0 }
  0xd8   : > { %v461_v30 = vpop.f32.mrf.mxu3 }
  0xd9   : > { %v462_v38 = vadd.f32 %v1042_v29, %v461_v30  ;;  %v1044_v30 = vld [vmem:[%s1448_s6] ss:$0 sm:$0xff] }
  0xda   : > { %v458_v32 = vpop.f32.mrf.mxu0 }
  0xdb   : > { %v459_v33 = vadd.f32 %v1042_v29, %v458_v32  ;;  %v478_v41 = vmax.f32 %v462_v38, 0.0 }
  0xdd   : > { %v477_v35 = vmax.f32 %v459_v33, 0.0 }
  0xdf   : > { %v484_v36 = vpack.c.bf16 %v477_v35, %v476_v34 }
  0xe0   : > { %v463_v37 = vpop.f32.mrf.mxu3 }
  0xe1   : > { %564 = vmatmul.bf16.vlgmr.msra.gmra.mxu1 %v484_v36  ;;  %v464_v39 = vadd.f32 %v1042_v29, %v463_v37 }
  0xe3   : > { %v479_v42 = vmax.f32 %v464_v39, 0.0 }
  0xe5   : > { %v485_v43 = vpack.c.bf16 %v479_v42, %v478_v41 }
  0xe8   : > { %v466_v40 = vpop.f32.mrf.mxu3 }
  0xe9   : > { %v467_v47 = vadd.f32 %v1042_v29, %v466_v40 }
  0xeb   : > { %v480_v51 = vmax.f32 %v467_v47, 0.0 }
  0xf0   : > { %v468_v44 = vpop.f32.mrf.mxu3 }
  0xf1   : > { %569 = vmatmul.bf16.gmra.mxu1 %v485_v43  ;;  %v469_v48 = vadd.f32 %v1042_v29, %v468_v44 }
  0xf3   : > { %v481_v52 = vmax.f32 %v469_v48, 0.0 }
  0xf5   : > { %v486_v54 = vpack.c.bf16 %v481_v52, %v480_v51 }
  0xf8   : > { %v471_v50 = vpop.f32.mrf.mxu3 }
  0xf9   : > { %v472_v56 = vadd.f32 %v1042_v29, %v471_v50 }
  0xfb   : > { %v482_v58 = vmax.f32 %v472_v56, 0.0 }
 0x100   : > { %v473_v55 = vpop.f32.mrf.mxu3 }
 0x101   : > { %574 = vmatmul.bf16.gmra.mxu1 %v486_v54  ;;  %v474_v57 = vadd.f32 %v1042_v29, %v473_v55 }
 0x103   : > { %v483_v59 = vmax.f32 %v474_v57, 0.0 }
 0x105   : > { %v487_v60 = vpack.c.bf16 %v483_v59, %v482_v58 }
 0x111   : > { %579 = vmatmul.bf16.gmra.mxu1 %v487_v60 }
 0x15e   : > { %v565_v1 = vpop.f32.mrf.mxu1 }
 0x15f   : > { %v566_v3 = vadd.f32 %v1043_v2, %v565_v1 }
 0x161   : > { %v585_v6 = vmax.f32 %v566_v3, 0.0 }
 0x166   : > { %v567_v4 = vpop.f32.mrf.mxu1 }
 0x167   : > { %v568_v5 = vadd.f32 %v1043_v2, %v567_v4 }
 0x169   : > { %v586_v7 = vmax.f32 %v568_v5, 0.0 }
 0x16b   : > { %v593_v8 = vpack.c.bf16 %v586_v7, %v585_v6 }
 0x16d   : > { %673 = vmatmul.bf16.vlgmr.msra.gmra.mxu2 %v593_v8 }
 0x16e   : > { %v570_v9 = vpop.f32.mrf.mxu1 }
 0x16f   : > { %v571_v10 = vadd.f32 %v1043_v2, %v570_v9 }
 0x171   : > { %v587_v13 = vmax.f32 %v571_v10, 0.0 }
 0x176   : > { %v572_v11 = vpop.f32.mrf.mxu1 }
 0x177   : > { %v573_v12 = vadd.f32 %v1043_v2, %v572_v11 }
 0x179   : > { %v588_v14 = vmax.f32 %v573_v12, 0.0 }
 0x17b   : > { %v594_v15 = vpack.c.bf16 %v588_v14, %v587_v13 }
 0x17d   : > { %678 = vmatmul.bf16.gmra.mxu2 %v594_v15 }
 0x17e   : > { %v575_v16 = vpop.f32.mrf.mxu1 }
 0x17f   : > { %v576_v17 = vadd.f32 %v1043_v2, %v575_v16 }
 0x181   : > { %v589_v20 = vmax.f32 %v576_v17, 0.0 }
 0x186   : > { %v577_v18 = vpop.f32.mrf.mxu1 }
 0x187   : > { %v578_v19 = vadd.f32 %v1043_v2, %v577_v18 }
 0x189   : > { %v590_v21 = vmax.f32 %v578_v19, 0.0 }
 0x18b   : > { %v595_v22 = vpack.c.bf16 %v590_v21, %v589_v20 }
 0x18d   : > { %683 = vmatmul.bf16.gmra.mxu2 %v595_v22 }
 0x18e   : > { %v580_v23 = vpop.f32.mrf.mxu1 }
 0x18f   : > { %v581_v24 = vadd.f32 %v1043_v2, %v580_v23 }
 0x191   : > { %v591_v27 = vmax.f32 %v581_v24, 0.0 }
 0x196   : > { %v582_v25 = vpop.f32.mrf.mxu1 }
 0x197   : > { %v583_v26 = vadd.f32 %v1043_v2, %v582_v25 }
 0x199   : > { %v592_v28 = vmax.f32 %v583_v26, 0.0 }
 0x19b   : > { %v596_v29 = vpack.c.bf16 %v592_v28, %v591_v27 }
 0x19d   : > { %688 = vmatmul.bf16.gmra.mxu2 %v596_v29 }
 0x1f0   : > { %v674_v31 = vpop.f32.mrf.mxu2 }
 0x1f1   : > { %v675_v32 = vadd.f32 %v1044_v30, %v674_v31 }
 0x1f3   : > { %695 = vst.msk [vmem:[%s365_s20] sm:$0xff] %vm694_vm0, %v675_v32 }
 0x1f8   : > { %v676_v33 = vpop.f32.mrf.mxu2 }
 0x1f9   : > { %v677_v34 = vadd.f32 %v1044_v30, %v676_v33 }
 0x1fb   : > { %696 = vst.msk [vmem:[%s365_s20 + $0x8] sm:$0xff] %vm694_vm0, %v677_v34 }
 0x200   : > { %v679_v35 = vpop.f32.mrf.mxu2 }
 0x201   : > { %v680_v36 = vadd.f32 %v1044_v30, %v679_v35 }
 0x203   : > { %697 = vst.msk [vmem:[%s365_s20 + $0x10] sm:$0xff] %vm694_vm0, %v680_v36 }
 0x208   : > { %v681_v37 = vpop.f32.mrf.mxu2 }
 0x209   : > { %v682_v38 = vadd.f32 %v1044_v30, %v681_v37 }
 0x20b   : > { %698 = vst.msk [vmem:[%s365_s20 + $0x18] sm:$0xff] %vm694_vm0, %v682_v38 }
 0x210   : > { %v684_v39 = vpop.f32.mrf.mxu2 }
 0x211   : > { %v685_v40 = vadd.f32 %v1044_v30, %v684_v39 }
 0x213   : > { %699 = vst.msk [vmem:[%s365_s20 + $0x20] sm:$0xff] %vm694_vm0, %v685_v40 }
 0x218   : > { %v686_v41 = vpop.f32.mrf.mxu2 }
 0x219   : > { %v687_v42 = vadd.f32 %v1044_v30, %v686_v41 }
 0x21b   : > { %700 = vst.msk [vmem:[%s365_s20 + $0x28] sm:$0xff] %vm694_vm0, %v687_v42 }
 0x220   : > { %v689_v43 = vpop.f32.mrf.mxu2 }
 0x221   : > { %v690_v44 = vadd.f32 %v1044_v30, %v689_v43 }
 0x223   : > { %701 = vst.msk [vmem:[%s365_s20 + $0x30] sm:$0xff] %vm694_vm0, %v690_v44 }
 0x228   : > { %v691_v45 = vpop.f32.mrf.mxu2 }
 0x229   : > { %v692_v46 = vadd.f32 %v1044_v30, %v691_v45 }
 0x22b   : > { %702 = vst.msk [vmem:[%s365_s20 + $0x38] sm:$0xff] %vm694_vm0, %v692_v46 }
 0x22c PF: > { %p19_p4 = scmp.ge.s32.totalorder %s1354_s17, 4   ;;  %s1457_s24 = smov %s1229_s25 }
 0x22d   : > { %s1458_s25 = smov %s1233_s26  ;;  %s1459_s26 = smov %s1365_s23 }
 0x22e   : > { %s1460_s27 = smov %s1354_s17  ;;  %21 = sbr.rel (!%p19_p4) target bundleno = 5 (0x5), region = 104 }
 0x233   :  { %725 = vsyncpa [#allocation3], 1 }
 0x234   :  { %727 = vsyncpa [#allocation3 + $0x1], 1 }
 0x235   :  { %728 = vsyncpa [#allocation5], 1 }
 0x236   :  { %729 = vsyncpa [#allocation8], 1 }

</bundles_post_ra>
